<compile_context>
chip_gen: v5e
topology: v5e:2x2
jax: 0.10.0
libtpu: 0.0.40
codegen_flags: <defaults>
</compile_context>

<pallas_src>
import jax
import jax.numpy as jnp
from jax.experimental import pallas as pl
from jax.experimental.pallas import tpu as pltpu


def two_layer_net_kernel(x_ref, w1_ref, b1_ref, w2_ref, b2_ref, o_ref):
    """relu(x @ w1 + b1) @ w2 + b2 for one (tm, D_in_p) row-tile of x."""
    # Cast the streaming x tile to the MXU operand dtype inside the kernel
    # (cheap VPU work that hides under the MXU; saves a wrapper pass over x).
    x = x_ref[...].astype(w1_ref.dtype)
    # linear1: bf16 MXU operands, f32 accumulation; bias + ReLU in f32
    # (f32 elementwise is required on v5e; free filler on MXU-bound shapes).
    h = jnp.dot(x, w1_ref[...], preferred_element_type=jnp.float32)
    h = jnp.maximum(h + b1_ref[...], 0.0)          # b1 is (1, H_p): broadcasts over rows
    # linear2: cast activations back to the MXU operand dtype.
    y = jnp.dot(h.astype(w2_ref.dtype), w2_ref[...],
                preferred_element_type=jnp.float32)
    o_ref[...] = (y + b2_ref[...]).astype(o_ref.dtype)   # b2 is (1, D_out_p)


def _round_up(a, m):
    return ((a + m - 1) // m) * m


def _pad2d(a, rows, cols):
    r, c = a.shape
    if r == rows and c == cols:
        return a
    return jnp.pad(a, ((0, rows - r), (0, cols - c)))


def _vmem_capacity_bytes():
    """Physical VMEM per TensorCore; conservative fallback works on all gens."""
    try:
        return int(pltpu.get_tpu_info().vmem_capacity_bytes)
    except Exception:
        return 64 * 1024 * 1024  # v7x per-TC size; safe lower bound for v5e/v6e


def two_layer_net(x, w1, b1, w2, b2, *, tm=1024,
                  compute_dtype=jnp.bfloat16, out_dtype=None):
    """x: (N, D_in), w1: (D_in, H), b1: (1, H), w2: (H, D_out), b2: (1, D_out).

    Computes relu(x @ w1 + b1) @ w2 + b2 (the PyTorch TwoLayerNet forward, with
    weights pre-transposed to (in, out))."""
    N, D_in = x.shape
    H = w1.shape[1]
    D_out = w2.shape[1]
    out_dtype = x.dtype if out_dtype is None else out_dtype

    # Lane-dense / MXU-aligned padding of the feature dims.
    D_in_p = _round_up(D_in, 128)
    H_p = _round_up(H, 128)
    D_out_p = _round_up(D_out, 128)

    x_bytes = jnp.dtype(x.dtype).itemsize
    o_bytes = jnp.dtype(out_dtype).itemsize
    c_bytes = jnp.dtype(compute_dtype).itemsize

    def vmem_footprint(tm_):
        # Streamed operands: double-buffered by the pipeline.
        stream = tm_ * D_in_p * x_bytes * 2 + tm_ * D_out_p * o_bytes * 2
        # Resident weights/biases: single-buffered (pl.Buffered(1)).
        resident = (D_in_p * H_p + H_p * D_out_p) * c_bytes + (H_p + D_out_p) * 4
        # In-kernel intermediates: bf16 x cast, f32 h, bf16 h, f32 y.
        interm = (tm_ * D_in_p * c_bytes
                  + tm_ * H_p * (4 + c_bytes)
                  + tm_ * D_out_p * 4)
        return stream + resident + interm

    budget = int(_vmem_capacity_bytes() * 0.85)

    # Row tile: multiple of 128, never larger than the padded batch.
    tm = min(_round_up(tm, 128), _round_up(N, 128))
    # Ensure >=2 grid steps for mid/large batches so both v7x TCs get work.
    if N >= 256 and _round_up(N, tm) // tm < 2:
        tm = _round_up(N, 256) // 2
    # Shrink tm (128-row steps) until the VMEM footprint fits the budget.
    while tm > 128 and vmem_footprint(tm) > budget:
        tm -= 128
    # TODO(synk): if resident weights alone exceed the budget (huge H on v7x),
    # fall back to a contraction/hidden-dim tiled grid with an f32 accumulator.

    N_p = _round_up(N, tm)

    # Zero-pad (inert for the matmuls). x keeps its original dtype: the bf16
    # cast happens on the tile inside the kernel. Weights are bf16 MXU operands.
    xp = _pad2d(x, N_p, D_in_p)
    w1p = _pad2d(w1, D_in_p, H_p).astype(compute_dtype)
    w2p = _pad2d(w2, H_p, D_out_p).astype(compute_dtype)
    b1p = _pad2d(b1, 1, H_p).astype(jnp.float32)
    b2p = _pad2d(b2, 1, D_out_p).astype(jnp.float32)

    grid = (N_p // tm,)
    out = pl.pallas_call(
        two_layer_net_kernel,
        out_shape=jax.ShapeDtypeStruct((N_p, D_out_p), out_dtype),
        grid_spec=pl.GridSpec(
            grid=grid,
            in_specs=[
                # x streams per row-tile (default double buffering).
                pl.BlockSpec((tm, D_in_p), lambda i: (i, 0)),
                # Weights/biases: constant block index -> single buffer.
                pl.BlockSpec((D_in_p, H_p), lambda i: (0, 0),
                             pipeline_mode=pl.Buffered(1)),
                pl.BlockSpec((1, H_p), lambda i: (0, 0),
                             pipeline_mode=pl.Buffered(1)),
                pl.BlockSpec((H_p, D_out_p), lambda i: (0, 0),
                             pipeline_mode=pl.Buffered(1)),
                pl.BlockSpec((1, D_out_p), lambda i: (0, 0),
                             pipeline_mode=pl.Buffered(1)),
            ],
            out_specs=pl.BlockSpec((tm, D_out_p), lambda i: (i, 0)),
        ),
        compiler_params=pltpu.CompilerParams(
            dimension_semantics=("parallel",),   # independent row-tiles
            vmem_limit_bytes=budget,             # derived from actual HW capacity
        ),
    )(xp, w1p, b1p, w2p, b2p)

    # Drop the row / output-lane padding.
    return out[:N, :D_out]


def init_linear(key, fan_in, fan_out, dtype=jnp.float32):
    """PyTorch nn.Linear default init: U(-1/sqrt(fan_in), 1/sqrt(fan_in)).
    Returns weight already transposed to (fan_in, fan_out) plus bias (1, fan_out)."""
    kw, kb = jax.random.split(key)
    bound = 1.0 / jnp.sqrt(jnp.asarray(fan_in, dtype))
    w = jax.random.uniform(kw, (fan_in, fan_out), dtype, minval=-bound, maxval=bound)
    b = jax.random.uniform(kb, (1, fan_out), dtype, minval=-bound, maxval=bound)
    return w, b


if __name__ == "__main__":
    # Small shapes consistent with the module: N samples, D_in -> H -> D_out.
    N, D_in, H, D_out = 8, 32, 64, 16

    key = jax.random.PRNGKey(0)
    kx, k1, k2 = jax.random.split(key, 3)

    x = jax.random.normal(kx, (N, D_in), jnp.float32)
    w1, b1 = init_linear(k1, D_in, H)
    w2, b2 = init_linear(k2, H, D_out)

    y_pred = two_layer_net(x, w1, b1, w2, b2)
    jax.block_until_ready(y_pred)
    assert y_pred.shape == (N, D_out)

    # Reference that mirrors the kernel's numerics (bf16 MXU operands, f32 accum).
    xb = x.astype(jnp.bfloat16)
    w1b = w1.astype(jnp.bfloat16)
    w2b = w2.astype(jnp.bfloat16)
    h_ref = jnp.maximum(
        jnp.dot(xb, w1b, preferred_element_type=jnp.float32) + b1, 0.0)
    y_ref_bf16 = (jnp.dot(h_ref.astype(jnp.bfloat16), w2b,
                          preferred_element_type=jnp.float32) + b2)
    assert jnp.allclose(y_pred, y_ref_bf16, atol=1e-3, rtol=1e-3)

    # Sanity check against the pure-f32 PyTorch forward (loose tol for bf16 operands).
    y_ref_f32 = jnp.maximum(x @ w1 + b1, 0.0) @ w2 + b2
    assert jnp.allclose(y_pred, y_ref_f32, atol=5e-2, rtol=5e-2)

    print("KERNEL_OK")
</pallas_src>

<mosaic_0001>
module attributes {stable_mosaic.version = 11 : i64} {
  func.func @two_layer_net_kernel(%arg0: i32, %arg1: memref<128x128xf32, #tpu.memory_space<vmem>>, %arg2: memref<128x128xbf16, #tpu.memory_space<vmem>>, %arg3: memref<1x128xf32, #tpu.memory_space<vmem>>, %arg4: memref<128x128xbf16, #tpu.memory_space<vmem>>, %arg5: memref<1x128xf32, #tpu.memory_space<vmem>>, %arg6: memref<128x128xf32, #tpu.memory_space<vmem>>) attributes {dimension_semantics = [#tpu.dimension_semantics<parallel>], iteration_bounds = array<i64: 1>, scalar_prefetch = 0 : i64, scratch_operands = 0 : i64, tpu.core_type = #tpu.core_type<tc>, window_params = [{transform_indices = @transform_0, window_bounds = array<i64: 128, 128>}, {pipeline_mode = #tpu.pipeline_mode<synchronous>, transform_indices = @transform_1, window_bounds = array<i64: 128, 128>}, {pipeline_mode = #tpu.pipeline_mode<synchronous>, transform_indices = @transform_2, window_bounds = array<i64: 1, 128>}, {pipeline_mode = #tpu.pipeline_mode<synchronous>, transform_indices = @transform_3, window_bounds = array<i64: 128, 128>}, {pipeline_mode = #tpu.pipeline_mode<synchronous>, transform_indices = @transform_4, window_bounds = array<i64: 1, 128>}, {transform_indices = @transform_5, window_bounds = array<i64: 128, 128>}]} {
    %c0 = arith.constant 0 : index
    %c0_0 = arith.constant 0 : index
    %0 = vector.load %arg1[%c0, %c0_0] : memref<128x128xf32, #tpu.memory_space<vmem>>, vector<128x128xf32>
    %1 = arith.truncf %0 : vector<128x128xf32> to vector<128x128xbf16>
    %c0_1 = arith.constant 0 : index
    %c0_2 = arith.constant 0 : index
    %2 = vector.load %arg2[%c0_1, %c0_2] : memref<128x128xbf16, #tpu.memory_space<vmem>>, vector<128x128xbf16>
    %cst = arith.constant dense<0.000000e+00> : vector<128x128xf32>
    %3 = tpu.matmul %1, %2, %cst {dimension_numbers = #tpu.dot_dimension_numbers<[1], [0], [0], [1], [0, 0, 1, 1], [], []>} : vector<128x128xbf16>, vector<128x128xbf16>, vector<128x128xf32> -> vector<128x128xf32>
    %c0_3 = arith.constant 0 : index
    %c0_4 = arith.constant 0 : index
    %4 = vector.load %arg3[%c0_3, %c0_4] : memref<1x128xf32, #tpu.memory_space<vmem>>, vector<1x128xf32>
    %5 = vector.broadcast %4 : vector<1x128xf32> to vector<128x128xf32>
    %6 = arith.addf %3, %5 : vector<128x128xf32>
    %cst_5 = arith.constant 0.000000e+00 : f32
    %7 = vector.broadcast %cst_5 : f32 to vector<128x128xf32>
    %8 = arith.maximumf %6, %7 : vector<128x128xf32>
    %9 = arith.truncf %8 : vector<128x128xf32> to vector<128x128xbf16>
    %c0_6 = arith.constant 0 : index
    %c0_7 = arith.constant 0 : index
    %10 = vector.load %arg4[%c0_6, %c0_7] : memref<128x128xbf16, #tpu.memory_space<vmem>>, vector<128x128xbf16>
    %cst_8 = arith.constant dense<0.000000e+00> : vector<128x128xf32>
    %11 = tpu.matmul %9, %10, %cst_8 {dimension_numbers = #tpu.dot_dimension_numbers<[1], [0], [0], [1], [0, 0, 1, 1], [], []>} : vector<128x128xbf16>, vector<128x128xbf16>, vector<128x128xf32> -> vector<128x128xf32>
    %c0_9 = arith.constant 0 : index
    %c0_10 = arith.constant 0 : index
    %12 = vector.load %arg5[%c0_9, %c0_10] : memref<1x128xf32, #tpu.memory_space<vmem>>, vector<1x128xf32>
    %13 = vector.broadcast %12 : vector<1x128xf32> to vector<128x128xf32>
    %14 = arith.addf %11, %13 : vector<128x128xf32>
    %c0_11 = arith.constant 0 : index
    %c0_12 = arith.constant 0 : index
    %15 = vector.load %arg6[%c0_11, %c0_12] : memref<128x128xf32, #tpu.memory_space<vmem>>, vector<128x128xf32>
    tpu.vector_store %arg6[%c0_11, %c0_12], %14 {strides = array<i32>} : memref<128x128xf32, #tpu.memory_space<vmem>>, vector<128x128xf32>,
    return
  }
  func.func @transform_0(%arg0: i32) -> (i32, i32) {
    %c0_i32 = arith.constant 0 : i32
    %c0_i32_0 = arith.constant 0 : i32
    return %arg0, %c0_i32 : i32, i32
  }
  func.func @transform_1(%arg0: i32) -> (i32, i32) {
    %c0_i32 = arith.constant 0 : i32
    %c0_i32_0 = arith.constant 0 : i32
    %c0_i32_1 = arith.constant 0 : i32
    return %c0_i32, %c0_i32_0 : i32, i32
  }
  func.func @transform_2(%arg0: i32) -> (i32, i32) {
    %c0_i32 = arith.constant 0 : i32
    %c0_i32_0 = arith.constant 0 : i32
    %c0_i32_1 = arith.constant 0 : i32
    return %c0_i32, %c0_i32_0 : i32, i32
  }
  func.func @transform_3(%arg0: i32) -> (i32, i32) {
    %c0_i32 = arith.constant 0 : i32
    %c0_i32_0 = arith.constant 0 : i32
    %c0_i32_1 = arith.constant 0 : i32
    return %c0_i32, %c0_i32_0 : i32, i32
  }
  func.func @transform_4(%arg0: i32) -> (i32, i32) {
    %c0_i32 = arith.constant 0 : i32
    %c0_i32_0 = arith.constant 0 : i32
    %c0_i32_1 = arith.constant 0 : i32
    return %c0_i32, %c0_i32_0 : i32, i32
  }
  func.func @transform_5(%arg0: i32) -> (i32, i32) {
    %c0_i32 = arith.constant 0 : i32
    %c0_i32_0 = arith.constant 0 : i32
    return %arg0, %c0_i32 : i32, i32
  }
}

</mosaic_0001>

<bundles_post_ra>
// kernel: tpu_custom_call.1
= control target key start
LH: loop header
LB: loop body
LE: loop exit
PB: predicated region body
PF: predicated region fallthrough
CT: control target
= control target key end

     0   :  { %10 = vsyncpa [#allocation3], 0  ;;  %s656_s0 = inlined_call_operand.hbm [shape: f32[128,128], index: 0, kind: input, shape index: {}]   ;;  %s657_s1 = inlined_call_operand.hbm [shape: bf16[128,128], index: 1, kind: input, shape index: {}]   ;;  %s658_s2 = inlined_call_operand.vmem [shape: f32[1,128], index: 2, kind: input, shape index: {}]   ;;  %s659_s3 = inlined_call_operand.hbm [shape: bf16[128,128], index: 3, kind: input, shape index: {}]   ;;  %s660_s4 = inlined_call_operand.vmem [shape: f32[1,128], index: 4, kind: input, shape index: {}]   ;;  %s661_s5 = inlined_call_operand.hbm [shape: f32[128,128], index: 5, kind: output, shape index: {}]  }
   0x1   :  { %11 = vsyncpa [#allocation6], 0  ;;  %s30_s20 = sshll.u32 %s657_s1, 4  ;;  %s31_s20 = int_to_ptr.hbm [resolvable:$true] %s30_s20 }
   0x2   :  { %12 = vsyncpa [#allocation4], 0  ;;  %s594_s21 = smov [#allocation5]   ;;  %s17_s25 = sshll.u32 %s656_s0, 4  ;;  %s18_s25 = int_to_ptr.hbm [resolvable:$true] %s17_s25 }
   0x3   :  { %s32_s22 = sshll.u32 %s594_s21, 4  ;;  %s595_s26 = smov 64   ;;  %s33_s22 = int_to_ptr.vmem [resolvable:$true] %s32_s22 }
   0x4   :  { %s596_s27 = smov 4   ;;  %s597_s28 = smov [#allocation2]  }
   0x5   :  { %38 = dma.hbm_to_vmem [thread:$0]  %s31_s20, 1024, %s33_s22, [#allocation6], %s595_s26, %s595_s26, %s596_s27  }
   0x6   :  { %s19_s29 = sshll.u32 %s597_s28, 4  ;;  %s598_s30 = smov 128   ;;  %s20_s29 = int_to_ptr.vmem [resolvable:$true] %s19_s29 }
   0x7   :  { %s599_s6 = smov 8   ;;  %s45_s8 = sshll.u32 %s659_s3, 4  ;;  %s46_s8 = int_to_ptr.hbm [resolvable:$true] %s45_s8 }
   0x8   :  { %25 = dma.hbm_to_vmem [thread:$0]  %s18_s25, 2048, %s20_s29, [#allocation3], %s598_s30, %s598_s30, %s599_s6  }
   0x9   :  { %s600_s9 = smov [#allocation7]  }
   0xa   :  { %s47_s0 = sshll.u32 %s600_s9, 4  ;;  %s48_s0 = int_to_ptr.vmem [resolvable:$true] %s47_s0 }
   0xb   :  { %53 = dma.hbm_to_vmem [thread:$0]  %s46_s8, 1024, %s48_s0, [#allocation6], %s595_s26, %s595_s26, %s596_s27  }
   0xc   :  { %588 = dma.done.wait [#allocation3], 2048  }
   0xd   :  { %589 = vsyncadd [#allocation3], 4294965248 }
   0xe   :  { %590 = dma.done.wait [#allocation6], 2048  }
   0xf   :  { %591 = vsyncadd [#allocation6], 4294965248  ;;  %v457_v0 = vld [vmem:[#allocation5 + $0x38] sm:$0xff]  ;;  %v456_v1 = vld [vmem:[#allocation5 + $0x30] sm:$0xff]  ;;  %s372_s15 = sshll.u32 %s661_s5, 4  ;;  %s373_s15 = int_to_ptr.hbm [resolvable:$true] %s372_s15 }
  0x10   :  { %160 = vmatpush.bf16.msra.mxu0 %v457_v0  ;;  %466 = vmatpush.bf16.msra.mxu2 %v457_v0  ;;  %v455_v2 = vld [vmem:[#allocation5 + $0x28] sm:$0xff]  ;;  %v454_v3 = vld [vmem:[#allocation5 + $0x20] sm:$0xff]  ;;  %v453_v4 = vld [vmem:[#allocation5 + $0x18] sm:$0xff] }
  0x11   :  { %v452_v5 = vld [vmem:[#allocation5 + $0x10] sm:$0xff]  ;;  %v451_v6 = vld [vmem:[#allocation5 + $0x8] sm:$0xff]  ;;  %v450_v7 = vld [vmem:[#allocation5] sm:$0xff] }
  0x12   :  { %v68_v8 = vld [vmem:[#allocation2] sm:$0xff]  ;;  %v69_v9 = vld [vmem:[#allocation2 + $0x8] sm:$0xff]  ;;  %v70_v14 = vld [vmem:[#allocation2 + $0x10] sm:$0xff] }
  0x13   :  { %v76_v10 = vld [vmem:[#allocation2 + $0x40] sm:$0xff]  ;;  %v77_v11 = vld [vmem:[#allocation2 + $0x48] sm:$0xff]  ;;  %v84_v12 = vpack.c.bf16 %v69_v9, %v68_v8  ;;  %v71_v15 = vld [vmem:[#allocation2 + $0x18] sm:$0xff] }
  0x14   :  { %161 = vmatpush.bf16.msra.mxu0 %v456_v1  ;;  %467 = vmatpush.bf16.msra.mxu2 %v456_v1  ;;  %v88_v13 = vpack.c.bf16 %v77_v11, %v76_v10  ;;  %v78_v16 = vld [vmem:[#allocation2 + $0x50] sm:$0xff]  ;;  %v79_v17 = vld [vmem:[#allocation2 + $0x58] sm:$0xff]  ;;  %v85_v18 = vpack.c.bf16 %v71_v15, %v70_v14  ;;  %v463_v22 = vld [vmem:[#allocation7 + $0x28] sm:$0xff] }
  0x15   :  { %v89_v19 = vpack.c.bf16 %v79_v17, %v78_v16  ;;  %v465_v20 = vld [vmem:[#allocation7 + $0x38] sm:$0xff]  ;;  %v464_v21 = vld [vmem:[#allocation7 + $0x30] sm:$0xff]  ;;  %v72_v23 = vld [vmem:[#allocation2 + $0x20] sm:$0xff] }
  0x16   :  { %301 = vmatpush.bf16.msra.mxu1 %v465_v20  ;;  %474 = vmatpush.bf16.msra.mxu3 %v465_v20  ;;  %v73_v24 = vld [vmem:[#allocation2 + $0x28] sm:$0xff]  ;;  %v80_v25 = vld [vmem:[#allocation2 + $0x60] sm:$0xff]  ;;  %v74_v30 = vld [vmem:[#allocation2 + $0x30] sm:$0xff] }
  0x17   :  { %v81_v26 = vld [vmem:[#allocation2 + $0x68] sm:$0xff]  ;;  %v462_v27 = vld [vmem:[#allocation7 + $0x20] sm:$0xff]  ;;  %v86_v28 = vpack.c.bf16 %v73_v24, %v72_v23  ;;  %v75_v31 = vld [vmem:[#allocation2 + $0x38] sm:$0xff] }
  0x18   :  { %162 = vmatpush.bf16.msra.mxu0 %v455_v2  ;;  %468 = vmatpush.bf16.msra.mxu2 %v455_v2  ;;  %v90_v29 = vpack.c.bf16 %v81_v26, %v80_v25  ;;  %v82_v32 = vld [vmem:[#allocation2 + $0x70] sm:$0xff]  ;;  %v83_v33 = vld [vmem:[#allocation2 + $0x78] sm:$0xff]  ;;  %v87_v34 = vpack.c.bf16 %v75_v31, %v74_v30  ;;  %v459_v38 = vld [vmem:[#allocation7 + $0x8] sm:$0xff] }
  0x19   :  { %v91_v35 = vpack.c.bf16 %v83_v33, %v82_v32  ;;  %v461_v36 = vld [vmem:[#allocation7 + $0x18] sm:$0xff]  ;;  %v460_v37 = vld [vmem:[#allocation7 + $0x10] sm:$0xff]  ;;  %v458_v39 = vld [vmem:[#allocation7] sm:$0xff] }
  0x1a   :  { %302 = vmatpush.bf16.msra.mxu1 %v464_v21  ;;  %475 = vmatpush.bf16.msra.mxu3 %v464_v21  ;;  %v490_v41 = vld [vmem:[%s658_s2] ss:$0 sm:$0xff] }
  0x1b   :  { %v491_v33 = vld [vmem:[%s660_s4] ss:$0 sm:$0xff]  ;;  %s601_s4 = smov [#allocation8]  }
  0x1c   :  { %163 = vmatpush.bf16.msra.mxu0 %v454_v3  ;;  %469 = vmatpush.bf16.msra.mxu2 %v454_v3  ;;  %s370_s12 = sshll.u32 %s601_s4, 4  ;;  %s371_s12 = int_to_ptr.vmem [resolvable:$true] %s370_s12 }
  0x1e   :  { %303 = vmatpush.bf16.msra.mxu1 %v463_v22  ;;  %476 = vmatpush.bf16.msra.mxu3 %v463_v22 }
  0x20   :  { %164 = vmatpush.bf16.msra.mxu0 %v453_v4  ;;  %470 = vmatpush.bf16.msra.mxu2 %v453_v4 }
  0x22   :  { %304 = vmatpush.bf16.msra.mxu1 %v462_v27  ;;  %477 = vmatpush.bf16.msra.mxu3 %v462_v27 }
  0x24   :  { %165 = vmatpush.bf16.msra.mxu0 %v452_v5  ;;  %471 = vmatpush.bf16.msra.mxu2 %v452_v5 }
  0x26   :  { %305 = vmatpush.bf16.msra.mxu1 %v461_v36  ;;  %478 = vmatpush.bf16.msra.mxu3 %v461_v36 }
  0x28   :  { %166 = vmatpush.bf16.msra.mxu0 %v451_v6  ;;  %472 = vmatpush.bf16.msra.mxu2 %v451_v6 }
  0x2a   :  { %306 = vmatpush.bf16.msra.mxu1 %v460_v37  ;;  %479 = vmatpush.bf16.msra.mxu3 %v460_v37 }
  0x2c   :  { %167 = vmatpush.bf16.msra.mxu0 %v450_v7  ;;  %473 = vmatpush.bf16.msra.mxu2 %v450_v7 }
  0x2e   :  { %307 = vmatpush.bf16.msra.mxu1 %v459_v38  ;;  %480 = vmatpush.bf16.msra.mxu3 %v459_v38 }
  0x2f   :  { %168 = vmatmul.bf16.vlgmr.msra.gmra.mxu0 %v84_v12  ;;  %188 = vmatmul.bf16.vlgmr.msra.gmra.mxu2 %v88_v13 }
  0x32   :  { %308 = vmatpush.bf16.msra.mxu1 %v458_v39  ;;  %481 = vmatpush.bf16.msra.mxu3 %v458_v39 }
  0x3f   :  { %173 = vmatmul.bf16.gmra.mxu0 %v85_v18  ;;  %193 = vmatmul.bf16.gmra.mxu2 %v89_v19 }
  0x4f   :  { %178 = vmatmul.bf16.gmra.mxu0 %v86_v28  ;;  %198 = vmatmul.bf16.gmra.mxu2 %v90_v29 }
  0x5f   :  { %183 = vmatmul.bf16.gmra.mxu0 %v87_v34  ;;  %203 = vmatmul.bf16.gmra.mxu2 %v91_v35 }
  0xac   :  { %v169_v40 = vpop.f32.mrf.mxu0 }
  0xad   :  { %v170_v42 = vadd.f32 %v490_v41, %v169_v40 }
  0xaf   :  { %v209_v45 = vmax.f32 %v170_v42, 0.0 }
  0xb2   :  { %v189_v43 = vpop.f32.mrf.mxu2 }
  0xb3   :  { %v190_v48 = vadd.f32 %v490_v41, %v189_v43 }
  0xb4   :  { %v171_v44 = vpop.f32.mrf.mxu0 }
  0xb5   :  { %v172_v46 = vadd.f32 %v490_v41, %v171_v44  ;;  %v217_v53 = vmax.f32 %v190_v48, 0.0 }
  0xb7   :  { %v210_v47 = vmax.f32 %v172_v46, 0.0 }
  0xb9   :  { %v225_v49 = vpack.c.bf16 %v210_v47, %v209_v45 }
  0xba   :  { %v191_v50 = vpop.f32.mrf.mxu2 }
  0xbb   :  { %v192_v51 = vadd.f32 %v490_v41, %v191_v50  ;;  %309 = vmatmul.bf16.vlgmr.msra.gmra.mxu1 %v225_v49 }
  0xbc   :  { %v174_v52 = vpop.f32.mrf.mxu0 }
  0xbd   :  { %v218_v54 = vmax.f32 %v192_v51, 0.0  ;;  %v175_v56 = vadd.f32 %v490_v41, %v174_v52 }
  0xbf   :  { %v229_v55 = vpack.c.bf16 %v218_v54, %v217_v53  ;;  %v211_v59 = vmax.f32 %v175_v56, 0.0 }
  0xc1   :  { %329 = vmatmul.bf16.vlgmr.msra.gmra.mxu3 %v229_v55 }
  0xc2   :  { %v194_v57 = vpop.f32.mrf.mxu2 }
  0xc3   :  { %v195_v62 = vadd.f32 %v490_v41, %v194_v57 }
  0xc4   :  { %v176_v58 = vpop.f32.mrf.mxu0 }
  0xc5   :  { %v177_v60 = vadd.f32 %v490_v41, %v176_v58  ;;  %v219_v3 = vmax.f32 %v195_v62, 0.0 }
  0xc7   :  { %v212_v61 = vmax.f32 %v177_v60, 0.0 }
  0xc9   :  { %v226_v63 = vpack.c.bf16 %v212_v61, %v211_v59 }
  0xca   :  { %v196_v0 = vpop.f32.mrf.mxu2 }
  0xcb   :  { %v197_v1 = vadd.f32 %v490_v41, %v196_v0  ;;  %314 = vmatmul.bf16.gmra.mxu1 %v226_v63 }
  0xcc   :  { %v179_v2 = vpop.f32.mrf.mxu0 }
  0xcd   :  { %v220_v4 = vmax.f32 %v197_v1, 0.0  ;;  %v180_v6 = vadd.f32 %v490_v41, %v179_v2 }
  0xcf   :  { %v230_v5 = vpack.c.bf16 %v220_v4, %v219_v3  ;;  %v213_v9 = vmax.f32 %v180_v6, 0.0 }
  0xd1   :  { %334 = vmatmul.bf16.gmra.mxu3 %v230_v5 }
  0xd2   :  { %v199_v7 = vpop.f32.mrf.mxu2 }
  0xd3   :  { %v200_v12 = vadd.f32 %v490_v41, %v199_v7 }
  0xd4   :  { %v181_v8 = vpop.f32.mrf.mxu0 }
  0xd5   :  { %v182_v10 = vadd.f32 %v490_v41, %v181_v8  ;;  %v221_v17 = vmax.f32 %v200_v12, 0.0 }
  0xd7   :  { %v214_v11 = vmax.f32 %v182_v10, 0.0 }
  0xd9   :  { %v227_v13 = vpack.c.bf16 %v214_v11, %v213_v9 }
  0xda   :  { %v201_v14 = vpop.f32.mrf.mxu2 }
  0xdb   :  { %v202_v15 = vadd.f32 %v490_v41, %v201_v14  ;;  %319 = vmatmul.bf16.gmra.mxu1 %v227_v13 }
  0xdc   :  { %v184_v16 = vpop.f32.mrf.mxu0 }
  0xdd   :  { %v222_v18 = vmax.f32 %v202_v15, 0.0  ;;  %v185_v20 = vadd.f32 %v490_v41, %v184_v16 }
  0xdf   :  { %v231_v19 = vpack.c.bf16 %v222_v18, %v221_v17  ;;  %v215_v23 = vmax.f32 %v185_v20, 0.0 }
  0xe1   :  { %339 = vmatmul.bf16.gmra.mxu3 %v231_v19 }
  0xe2   :  { %v204_v21 = vpop.f32.mrf.mxu2 }
  0xe3   :  { %v205_v26 = vadd.f32 %v490_v41, %v204_v21 }
  0xe4   :  { %v186_v22 = vpop.f32.mrf.mxu0 }
  0xe5   :  { %v187_v24 = vadd.f32 %v490_v41, %v186_v22  ;;  %v223_v30 = vmax.f32 %v205_v26, 0.0 }
  0xe7   :  { %v216_v25 = vmax.f32 %v187_v24, 0.0 }
  0xe9   :  { %v228_v27 = vpack.c.bf16 %v216_v25, %v215_v23 }
  0xea   :  { %v206_v28 = vpop.f32.mrf.mxu2 }
  0xeb   :  { %v207_v29 = vadd.f32 %v490_v41, %v206_v28  ;;  %324 = vmatmul.bf16.gmra.mxu1 %v228_v27 }
  0xed   :  { %v224_v31 = vmax.f32 %v207_v29, 0.0 }
  0xef   :  { %v232_v32 = vpack.c.bf16 %v224_v31, %v223_v30 }
  0xf1   :  { %344 = vmatmul.bf16.gmra.mxu3 %v232_v32 }
 0x138   :  { %v310_v34 = vpop.f32.mrf.mxu1 }
 0x139   :  { %v311_v35 = vadd.f32 %v491_v33, %v310_v34 }
 0x13b   :  { %350 = vst [vmem:[#allocation8] sm:$0xff] %v311_v35 }
 0x140   :  { %v312_v36 = vpop.f32.mrf.mxu1 }
 0x141   :  { %v313_v37 = vadd.f32 %v491_v33, %v312_v36 }
 0x143   :  { %351 = vst [vmem:[#allocation8 + $0x8] sm:$0xff] %v313_v37 }
 0x144   :  { %v330_v38 = vpop.f32.mrf.mxu3 }
 0x145   :  { %v331_v39 = vadd.f32 %v491_v33, %v330_v38 }
 0x147   :  { %358 = vst [vmem:[#allocation8 + $0x40] sm:$0xff] %v331_v39 }
 0x148   :  { %v315_v40 = vpop.f32.mrf.mxu1 }
 0x149   :  { %v316_v41 = vadd.f32 %v491_v33, %v315_v40 }
 0x14b   :  { %352 = vst [vmem:[#allocation8 + $0x10] sm:$0xff] %v316_v41 }
 0x14c   :  { %v332_v42 = vpop.f32.mrf.mxu3 }
 0x14d   :  { %v333_v43 = vadd.f32 %v491_v33, %v332_v42 }
 0x14f   :  { %359 = vst [vmem:[#allocation8 + $0x48] sm:$0xff] %v333_v43 }
 0x150   :  { %v317_v44 = vpop.f32.mrf.mxu1 }
 0x151   :  { %v318_v45 = vadd.f32 %v491_v33, %v317_v44 }
 0x153   :  { %353 = vst [vmem:[#allocation8 + $0x18] sm:$0xff] %v318_v45 }
 0x154   :  { %v335_v46 = vpop.f32.mrf.mxu3 }
 0x155   :  { %v336_v47 = vadd.f32 %v491_v33, %v335_v46 }
 0x157   :  { %360 = vst [vmem:[#allocation8 + $0x50] sm:$0xff] %v336_v47 }
 0x158   :  { %v320_v48 = vpop.f32.mrf.mxu1 }
 0x159   :  { %v321_v49 = vadd.f32 %v491_v33, %v320_v48 }
 0x15b   :  { %354 = vst [vmem:[#allocation8 + $0x20] sm:$0xff] %v321_v49 }
 0x15c   :  { %v337_v50 = vpop.f32.mrf.mxu3 }
 0x15d   :  { %v338_v51 = vadd.f32 %v491_v33, %v337_v50 }
 0x15f   :  { %361 = vst [vmem:[#allocation8 + $0x58] sm:$0xff] %v338_v51 }
 0x160   :  { %v322_v52 = vpop.f32.mrf.mxu1 }
 0x161   :  { %v323_v53 = vadd.f32 %v491_v33, %v322_v52 }
 0x163   :  { %355 = vst [vmem:[#allocation8 + $0x28] sm:$0xff] %v323_v53 }
 0x164   :  { %v340_v54 = vpop.f32.mrf.mxu3 }
 0x165   :  { %v341_v55 = vadd.f32 %v491_v33, %v340_v54 }
 0x167   :  { %362 = vst [vmem:[#allocation8 + $0x60] sm:$0xff] %v341_v55 }
 0x168   :  { %v325_v56 = vpop.f32.mrf.mxu1 }
 0x169   :  { %v326_v57 = vadd.f32 %v491_v33, %v325_v56 }
 0x16b   :  { %356 = vst [vmem:[#allocation8 + $0x30] sm:$0xff] %v326_v57 }
 0x16c   :  { %v342_v58 = vpop.f32.mrf.mxu3 }
 0x16d   :  { %v343_v59 = vadd.f32 %v491_v33, %v342_v58 }
 0x16f   :  { %363 = vst [vmem:[#allocation8 + $0x68] sm:$0xff] %v343_v59 }
 0x170   :  { %v327_v60 = vpop.f32.mrf.mxu1 }
 0x171   :  { %v328_v61 = vadd.f32 %v491_v33, %v327_v60 }
 0x173   :  { %357 = vst [vmem:[#allocation8 + $0x38] sm:$0xff] %v328_v61 }
 0x174   :  { %v345_v62 = vpop.f32.mrf.mxu3 }
 0x175   :  { %v346_v63 = vadd.f32 %v491_v33, %v345_v62 }
 0x177   :  { %364 = vst [vmem:[#allocation8 + $0x70] sm:$0xff] %v346_v63 }
 0x17c   :  { %v347_v0 = vpop.f32.mrf.mxu3 }
 0x17d   :  { %v348_v1 = vadd.f32 %v491_v33, %v347_v0 }
 0x17f   :  { %365 = vst [vmem:[#allocation8 + $0x78] sm:$0xff] %v348_v1 }
 0x180   :  { %378 = dma.vmem_to_hbm [thread:$0]  %s371_s12, 2048, %s373_s15, [#allocation4], %s598_s30, %s598_s30, %s599_s6  }
 0x181   :  { %592 = dma.done.wait [#allocation4], 2048  }
 0x182   :  { %593 = vsyncadd [#allocation4], 4294965248 }
 0x183   :  { %383 = vsyncpa [#allocation3], 1 }
 0x184   :  { %384 = vsyncpa [#allocation6], 1 }
 0x185   :  { %385 = vsyncpa [#allocation4], 1 }

</bundles_post_ra>
